<compile_context>
chip_gen: v6e
topology: v6e:2x2x1
jax: 0.10.0
libtpu: 0.0.40
codegen_flags: <defaults>
</compile_context>

<pallas_src>
import functools
import numpy as np
import jax
import jax.numpy as jnp
from jax.experimental import pallas as pl
from jax.experimental.pallas import tpu as pltpu

planes = 16
num_caps = 64
caps_size = 6
N_CLASS = 10  # TODO(synk): Alphabet file not available; class count fixed in-script.

F32 = jnp.float32
BF16 = jnp.bfloat16


def _round_up(x, m):
    return ((x + m - 1) // m) * m


def _compiler_params(**kw):
    cls = getattr(pltpu, "CompilerParams", None)
    if cls is None:  # compatibility with older jax releases
        cls = getattr(pltpu, "TPUCompilerParams")
    return cls(**kw)


def _sigmoid(x):
    # numerically-stable sigmoid that lowers to the EUP tanh unit
    return 0.5 * (jnp.tanh(0.5 * x) + 1.0)


def _pad_rows(M, tm=512):
    """Return (padded_M, tile_m) so padded_M % tile_m == 0 and tile_m % 8 == 0."""
    Mp = _round_up(max(M, 8), 8)
    if Mp > tm:
        return _round_up(M, tm), tm
    return Mp, Mp


# ---------------------------------------------------------------------------
# Pallas kernels
# ---------------------------------------------------------------------------

def _mm_bias_kernel(x_ref, w_ref, b_ref, o_ref):
    o_ref[...] = jnp.dot(x_ref[...], w_ref[...],
                         preferred_element_type=jnp.float32) + b_ref[...]


def _mm_stats_kernel(x_ref, w_ref, y_ref, ssum_ref, ssq_ref):
    y = jnp.dot(x_ref[...], w_ref[...], preferred_element_type=jnp.float32)
    y_ref[...] = y
    ssum_ref[0] = jnp.sum(y, axis=0, keepdims=True)
    ssq_ref[0] = jnp.sum(y * y, axis=0, keepdims=True)


def _affine_act_kernel(y_ref, sc_ref, sh_ref, o_ref, *, act):
    v = y_ref[...] * sc_ref[...] + sh_ref[...]
    if act == "relu":
        v = jnp.maximum(v, 0.0)
    elif act == "sigmoid":
        v = _sigmoid(v)
    o_ref[...] = v


def _bilstm_kernel(xp_ref, whh_ref, hseq_ref, h_sc, c_sc):
    # xp_ref: (1,1,B,4H) f32 (x@Wih + bih + bhh); whh_ref: (1,H,4H) bf16
    t = pl.program_id(1)

    @pl.when(t == 0)
    def _():
        h_sc[...] = jnp.zeros_like(h_sc)
        c_sc[...] = jnp.zeros_like(c_sc)

    H = h_sc.shape[-1]
    gates = xp_ref[0, 0] + jnp.dot(h_sc[...].astype(BF16), whh_ref[0],
                                   preferred_element_type=jnp.float32)
    i = _sigmoid(gates[:, 0:H])
    f = _sigmoid(gates[:, H:2 * H])
    g = jnp.tanh(gates[:, 2 * H:3 * H])
    o = _sigmoid(gates[:, 3 * H:4 * H])
    c_new = f * c_sc[...] + i * g
    h_new = o * jnp.tanh(c_new)
    c_sc[...] = c_new
    h_sc[...] = h_new
    hseq_ref[0, 0] = h_new


def _decoder_kernel(gi_ref, fp_ref, fc_ref, h2hw_ref, h2hb_ref, sw_ref,
                    wctx_ref, whh_ref, bhh_ref, hseq_ref, h_sc):
    # gi_ref: (1,B,3H) = emb @ W_emb + b_ih  (per decode step)
    # fp_ref: (T,B,H) = i2h(feats);  fc_ref: (T,B,C) = [feats | pose]
    step = pl.program_id(0)

    @pl.when(step == 0)
    def _():
        h_sc[...] = jnp.zeros_like(h_sc)

    h = h_sc[...]
    H = h.shape[-1]

    hproj = jnp.dot(h.astype(BF16), h2hw_ref[...],
                    preferred_element_type=jnp.float32) + h2hb_ref[...]
    e = jnp.tanh(fp_ref[...] + hproj[None, :, :])                 # (T,B,H)
    s = jnp.sum(e * sw_ref[...], axis=-1)                         # (T,B)
    m = jnp.max(s, axis=0, keepdims=True)
    ex = jnp.exp(s - m)
    alpha = ex * pl.reciprocal(jnp.sum(ex, axis=0, keepdims=True), approx=True)
    ctx = jnp.sum(fc_ref[...] * alpha[:, :, None], axis=0)        # (B,C)

    gi = jnp.dot(ctx.astype(BF16), wctx_ref[...],
                 preferred_element_type=jnp.float32) + gi_ref[0]
    gh = jnp.dot(h.astype(BF16), whh_ref[...],
                 preferred_element_type=jnp.float32) + bhh_ref[...]
    r = _sigmoid(gi[:, 0:H] + gh[:, 0:H])
    z = _sigmoid(gi[:, H:2 * H] + gh[:, H:2 * H])
    n = jnp.tanh(gi[:, 2 * H:3 * H] + r * gh[:, 2 * H:3 * H])
    h_new = (1.0 - z) * n + z * h
    h_sc[...] = h_new
    hseq_ref[0] = h_new


def _self_routing_kernel(pose_ref, a_ref, w1_ref, w2_ref, b2_ref, out_ref):
    # pose_ref: (C, bn, kkA); a_ref: (bn, kkA)
    # w1_ref: (D, C, Bc, kkA); w2_ref: (C, Bc, kkA); b2_ref: (Bc, kkA)
    # out_ref: (bn, Bc*(D+1))  ->  [a_out | pout_d0 | ... | pout_d{D-1}]
    C, bn, kkA = pose_ref.shape
    D = w1_ref.shape[0]
    Bc = w2_ref.shape[1]

    # hoist the per-capsule pose broadcasts (computed once, reused everywhere)
    pose = [pose_ref[c][:, None, :] for c in range(C)]            # (bn,1,kkA)
    a = a_ref[...]                                                # (bn,kkA)

    logit = jnp.broadcast_to(b2_ref[...][None, :, :], (bn, Bc, kkA))
    for c in range(C):
        logit = logit + pose[c] * w2_ref[c][None, :, :]
    m = jnp.max(logit, axis=1, keepdims=True)
    e = jnp.exp(logit - m)
    r = e * pl.reciprocal(jnp.sum(e, axis=1, keepdims=True), approx=True)

    ar = a[:, None, :] * r                                        # (bn,Bc,kkA)
    ar_sum = jnp.sum(ar, axis=2)                                  # (bn,Bc)
    a_sum = jnp.sum(a, axis=1, keepdims=True)                     # (bn,1)
    a_out = ar_sum * pl.reciprocal(a_sum, approx=True)
    coeff = ar * pl.reciprocal(ar_sum, approx=True)[:, :, None]

    # pose_out[n,b,d] = sum_c sum_k (coeff*pose[c])[n,b,k] * W1[d,c,b,k]
    accs = [jnp.zeros((bn, Bc), jnp.float32) for _ in range(D)]
    for c in range(C):
        cp = coeff * pose[c]                                      # once per c
        for d in range(D):
            accs[d] = accs[d] + jnp.sum(cp * w1_ref[d, c][None, :, :], axis=2)

    out_ref[...] = jnp.concatenate([a_out] + accs, axis=1)        # lane-dense


# ---------------------------------------------------------------------------
# Pallas call wrappers
# ---------------------------------------------------------------------------

def matmul_bias(x, w, b=None, tm=512):
    """y = x @ w + b with bf16 MXU operands, f32 accumulation, M-tiled grid."""
    M, K = x.shape
    N = w.shape[1]
    Mp, tmx = _pad_rows(M, tm)
    xp = x if Mp == M else jnp.pad(x, ((0, Mp - M), (0, 0)))
    xb = xp.astype(BF16)
    wb = jnp.asarray(w, F32).astype(BF16)
    bias = jnp.zeros((1, N), F32) if b is None else jnp.asarray(b, F32).reshape(1, N)
    y = pl.pallas_call(
        _mm_bias_kernel,
        out_shape=jax.ShapeDtypeStruct((Mp, N), F32),
        grid=(Mp // tmx,),
        in_specs=[pl.BlockSpec((tmx, K), lambda i: (i, 0)),
                  pl.BlockSpec((K, N), lambda i: (0, 0)),
                  pl.BlockSpec((1, N), lambda i: (0, 0))],
        out_specs=pl.BlockSpec((tmx, N), lambda i: (i, 0)),
        compiler_params=_compiler_params(
            dimension_semantics=("parallel",),
            vmem_limit_bytes=32 * 1024 * 1024),
    )(xb, wb, bias)
    return y if Mp == M else y[:M]


def _affine_act(y_pad, scale, shift, act, tm):
    Mp, N = y_pad.shape
    return pl.pallas_call(
        functools.partial(_affine_act_kernel, act=act),
        out_shape=jax.ShapeDtypeStruct((Mp, N), F32),
        grid=(Mp // tm,),
        in_specs=[pl.BlockSpec((tm, N), lambda i: (i, 0)),
                  pl.BlockSpec((1, N), lambda i: (0, 0)),
                  pl.BlockSpec((1, N), lambda i: (0, 0))],
        out_specs=pl.BlockSpec((tm, N), lambda i: (i, 0)),
        compiler_params=_compiler_params(
            dimension_semantics=("parallel",),
            vmem_limit_bytes=32 * 1024 * 1024),
    )(y_pad, scale.reshape(1, N).astype(F32), shift.reshape(1, N).astype(F32))


def im2col_nhwc(x, k, stride, padding):
    """x: (B,H,W,C) -> (B*Ho*Wo, kh*kw*C) with (kh, kw, c) column order."""
    B, H, W, C = x.shape
    kh, kw = k
    sh, sw = stride
    ph, pw = padding
    xp = jnp.pad(x, ((0, 0), (ph, ph), (pw, pw), (0, 0)))
    Ho = (H + 2 * ph - kh) // sh + 1
    Wo = (W + 2 * pw - kw) // sw + 1
    cols = []
    for i in range(kh):
        for j in range(kw):
            cols.append(xp[:, i:i + sh * Ho:sh, j:j + sw * Wo:sw, :])
    patches = jnp.concatenate(cols, axis=-1)
    return patches.reshape(B * Ho * Wo, kh * kw * C), Ho, Wo


def conv_bn_act(x_nhwc, w_oihw, gamma, beta, stride, pad, act, eps=1e-5, tm=512):
    """conv (im2col matmul) + BatchNorm(batch stats) + activation, fused."""
    Bn = x_nhwc.shape[0]
    Cout, Cin, kh, kw = w_oihw.shape
    Xp, Ho, Wo = im2col_nhwc(x_nhwc, (kh, kw), stride, pad)
    M, K = Xp.shape
    N = Cout
    Mp, tmx = _pad_rows(M, tm)
    if Mp != M:
        Xp = jnp.pad(Xp, ((0, Mp - M), (0, 0)))
    Xb = Xp.astype(BF16)
    Wm = jnp.transpose(w_oihw, (2, 3, 1, 0)).reshape(K, N).astype(BF16)
    G = Mp // tmx
    y, ssum, ssq = pl.pallas_call(
        _mm_stats_kernel,
        out_shape=(jax.ShapeDtypeStruct((Mp, N), F32),
                   jax.ShapeDtypeStruct((G, 1, N), F32),
                   jax.ShapeDtypeStruct((G, 1, N), F32)),
        grid=(G,),
        in_specs=[pl.BlockSpec((tmx, K), lambda i: (i, 0)),
                  pl.BlockSpec((K, N), lambda i: (0, 0))],
        out_specs=(pl.BlockSpec((tmx, N), lambda i: (i, 0)),
                   pl.BlockSpec((1, 1, N), lambda i: (i, 0, 0)),
                   pl.BlockSpec((1, 1, N), lambda i: (i, 0, 0))),
        compiler_params=_compiler_params(
            dimension_semantics=("parallel",),
            vmem_limit_bytes=32 * 1024 * 1024),
    )(Xb, Wm)
    mean = jnp.sum(ssum, axis=(0, 1)) / M
    var = jnp.maximum(jnp.sum(ssq, axis=(0, 1)) / M - mean * mean, 0.0)
    scale = gamma / jnp.sqrt(var + eps)
    shift = beta - mean * scale
    out = _affine_act(y, scale, shift, act, tmx)
    return out[:M].reshape(Bn, Ho, Wo, N)


def batchnorm_rows(y, gamma, beta, act=None, eps=1e-5, tm=512):
    M, N = y.shape
    mean = jnp.mean(y, axis=0)
    var = jnp.maximum(jnp.mean(y * y, axis=0) - mean * mean, 0.0)
    scale = gamma / jnp.sqrt(var + eps)
    shift = beta - mean * scale
    Mp, tmx = _pad_rows(M, tm)
    yp = y if Mp == M else jnp.pad(y, ((0, Mp - M), (0, 0)))
    return _affine_act(yp, scale, shift, act, tmx)[:M]


def bilstm_call(xp, whh_bf16):
    """Fused bidirectional LSTM: grid=(direction, T)."""
    ndir, T, B, H4 = xp.shape
    H = H4 // 4
    return pl.pallas_call(
        _bilstm_kernel,
        out_shape=jax.ShapeDtypeStruct((2, T, B, H), F32),
        grid=(2, T),
        in_specs=[pl.BlockSpec((1, 1, B, H4),
                               lambda d, t: (d, t + d * (T - 1 - 2 * t), 0, 0)),
                  pl.BlockSpec((1, H, H4), lambda d, t: (d, 0, 0))],
        out_specs=pl.BlockSpec((1, 1, B, H),
                               lambda d, t: (d, t + d * (T - 1 - 2 * t), 0, 0)),
        scratch_shapes=[pltpu.VMEM((B, H), F32), pltpu.VMEM((B, H), F32)],
        compiler_params=_compiler_params(
            dimension_semantics=("parallel", "arbitrary"),
            vmem_limit_bytes=32 * 1024 * 1024),
    )(xp, whh_bf16)


def blstm(x_seq, prm):
    T, B, In = x_seq.shape
    H = prm['whh_f'].shape[0]
    # one input projection for both directions (biases bih+bhh folded in)
    wih_cat = jnp.concatenate([prm['wih_f'], prm['wih_b']], axis=1)
    bias_cat = jnp.concatenate([prm['bih_f'] + prm['bhh_f'],
                                prm['bih_b'] + prm['bhh_b']], axis=0)
    xproj = matmul_bias(x_seq.reshape(T * B, In), wih_cat, bias_cat)
    xproj = xproj.reshape(T, B, 8 * H)
    xp = jnp.stack([xproj[:, :, :4 * H], xproj[:, :, 4 * H:]], axis=0)
    whh = jnp.stack([prm['whh_f'], prm['whh_b']], axis=0).astype(BF16)
    hseq = bilstm_call(xp, whh)                                   # (2,T,B,H)
    out = jnp.concatenate([hseq[0], hseq[1]], axis=2)             # (T,B,2H)
    y = matmul_bias(out.reshape(T * B, 2 * H), prm['lin_w'], prm['lin_b'])
    return y.reshape(T, B, -1)


def decoder_call(gi_emb, feats_proj, feats_cat, h2h_w, h2h_b, score_w,
                 w_ctx, gru_whh, gru_bhh):
    S, B, H3 = gi_emb.shape
    H = H3 // 3
    T = feats_proj.shape[0]
    C = feats_cat.shape[2]
    return pl.pallas_call(
        _decoder_kernel,
        out_shape=jax.ShapeDtypeStruct((S, B, H), F32),
        grid=(S,),
        in_specs=[pl.BlockSpec((1, B, H3), lambda i: (i, 0, 0)),
                  pl.BlockSpec((T, B, H), lambda i: (0, 0, 0)),
                  pl.BlockSpec((T, B, C), lambda i: (0, 0, 0)),
                  pl.BlockSpec((H, H), lambda i: (0, 0)),
                  pl.BlockSpec((1, H), lambda i: (0, 0)),
                  pl.BlockSpec((1, 1, H), lambda i: (0, 0, 0)),
                  pl.BlockSpec((C, H3), lambda i: (0, 0)),
                  pl.BlockSpec((H, H3), lambda i: (0, 0)),
                  pl.BlockSpec((1, H3), lambda i: (0, 0))],
        out_specs=pl.BlockSpec((1, B, H), lambda i: (i, 0, 0)),
        scratch_shapes=[pltpu.VMEM((B, H), F32)],
        compiler_params=_compiler_params(
            dimension_semantics=("arbitrary",),
            vmem_limit_bytes=32 * 1024 * 1024),
    )(gi_emb, feats_proj, feats_cat, h2h_w, h2h_b, score_w,
      w_ctx, gru_whh, gru_bhh)


def unfold_nchw(x, k, stride, padding):
    """F.unfold equivalent: x (B,C,H,W) -> (B, C*kh*kw, Ho*Wo), (c, kh, kw) order."""
    B, C, H, W = x.shape
    kh, kw = k
    sh, sw = stride
    ph, pw = padding
    xp = jnp.pad(x, ((0, 0), (0, 0), (ph, ph), (pw, pw)))
    Ho = (H + 2 * ph - kh) // sh + 1
    Wo = (W + 2 * pw - kw) // sw + 1
    cols = []
    for i in range(kh):
        for j in range(kw):
            cols.append(xp[:, :, i:i + sh * Ho:sh, j:j + sw * Wo:sw])
    patches = jnp.stack(cols, axis=2)                 # (B,C,kk,Ho,Wo)
    return patches.reshape(B, C * kh * kw, Ho * Wo), Ho, Wo


def self_routing2d(a_nchw, pose_nchw, prm):
    A, Bc, C, D = num_caps, num_caps, caps_size, caps_size
    k, stride, pad = 3, 1, 1
    b = a_nchw.shape[0]
    kk = k * k
    kkA = kk * A

    pose_p, oh, ow = unfold_nchw(pose_nchw, (k, k), (stride, stride), (pad, pad))
    l = oh * ow
    pose_u = pose_p.reshape(b, A, C, kk, l)
    pose_u = jnp.transpose(pose_u, (0, 4, 3, 1, 2)).reshape(b, l, kkA, C)
    a_p, _, _ = unfold_nchw(a_nchw, (k, k), (stride, stride), (pad, pad))
    a_u = jnp.transpose(a_p.reshape(b, A, kk, l), (0, 3, 2, 1)).reshape(b, l, kkA)

    N = b * l
    pose_cnk = jnp.transpose(pose_u.reshape(N, kkA, C), (2, 0, 1))   # (C,N,kkA)
    a_nk = a_u.reshape(N, kkA)

    bn = 8
    Np = _round_up(N, bn)
    if Np != N:
        pose_cnk = jnp.pad(pose_cnk, ((0, 0), (0, Np - N), (0, 0)))
        a_nk = jnp.pad(a_nk, ((0, Np - N), (0, 0)), constant_values=1.0)

    W1, W2, b2 = prm['W1'], prm['W2'], prm['b2']
    w1_dcbk = jnp.transpose(W1.reshape(kkA, Bc, D, C), (2, 3, 1, 0))  # (D,C,Bc,kkA)
    w2_cbk = jnp.transpose(W2, (2, 1, 0))                             # (C,Bc,kkA)
    b2_bk = jnp.transpose(b2.reshape(kkA, Bc), (1, 0))                # (Bc,kkA)

    out = pl.pallas_call(
        _self_routing_kernel,
        out_shape=jax.ShapeDtypeStruct((Np, Bc * (D + 1)), F32),
        grid=(Np // bn,),
        in_specs=[pl.BlockSpec((C, bn, kkA), lambda i: (0, i, 0)),
                  pl.BlockSpec((bn, kkA), lambda i: (i, 0)),
                  pl.BlockSpec((D, C, Bc, kkA), lambda i: (0, 0, 0, 0)),
                  pl.BlockSpec((C, Bc, kkA), lambda i: (0, 0, 0)),
                  pl.BlockSpec((Bc, kkA), lambda i: (0, 0))],
        out_specs=pl.BlockSpec((bn, Bc * (D + 1)), lambda i: (i, 0)),
        compiler_params=_compiler_params(
            dimension_semantics=("parallel",),
            vmem_limit_bytes=48 * 1024 * 1024),
    )(pose_cnk, a_nk, w1_dcbk, w2_cbk, b2_bk)

    out = out[:N]
    a_rows = out[:, :Bc]                                             # (N,Bc)
    pout = out[:, Bc:].reshape(N, D, Bc)
    pose_rows = jnp.transpose(pout, (0, 2, 1)).reshape(N, Bc * D)    # (bcap,d) order
    return a_rows, pose_rows, oh, ow


# ---------------------------------------------------------------------------
# Full forward pass
# ---------------------------------------------------------------------------

def rare_forward(params, x, text_length, text, text_rev=None, test=False):
    # ---- CNN backbone (NHWC internally): conv -> BN(batch stats) -> ReLU ----
    h = jnp.transpose(x.astype(F32), (0, 2, 3, 1))
    for layer in params['cnn']:
        h = conv_bn_act(h, layer['w'], layer['gamma'], layer['beta'],
                        layer['stride'], layer['pad'], act='relu')
    # h: (B, 1, W', 128)

    a_map = conv_bn_act(h, params['conv_a_w'], params['bn_a_g'],
                        params['bn_a_b'], (1, 1), (1, 1), act='sigmoid')
    pose_map = conv_bn_act(h, params['conv_pose_w'], params['bn_pose_g'],
                           params['bn_pose_b'], (1, 1), (1, 1), act=None)
    a_nchw = jnp.transpose(a_map, (0, 3, 1, 2))
    pose_nchw = jnp.transpose(pose_map, (0, 3, 1, 2))

    # ---- capsule self-routing + BN ----
    a_rows, pose_rows, oh, ow = self_routing2d(a_nchw, pose_nchw, params['route'])
    assert oh == 1, 'The height of the input image must be 1.'
    pose_rows = batchnorm_rows(pose_rows, params['route_bn_g'], params['route_bn_b'])

    b = x.shape[0]
    l = oh * ow
    feats = jnp.transpose(a_rows.reshape(b, l, num_caps), (1, 0, 2))        # (T,B,64)
    pose_feat = jnp.transpose(pose_rows.reshape(b, l, num_caps * caps_size),
                              (1, 0, 2))                                    # (T,B,384)

    # ---- encoder: 2 stacked fused bidirectional LSTMs ----
    feats = blstm(feats, params['blstm1'])
    feats = blstm(feats, params['blstm2'])                                  # (T,B,256)

    # ---- attention decoder (training path) ----
    # TODO(synk): test=True greedy-decode branch not implemented (train path only).
    T, nB, nC = feats.shape
    H = 256
    text_length = np.asarray(text_length)
    text = np.asarray(text)
    num_steps = int(text_length.max())
    # TODO(synk): host-side target construction prevents jitting the full forward.
    targets = np.zeros((nB, num_steps + 1), np.int32)
    start = 0
    for i in range(nB):
        L = int(text_length[i])
        targets[i, 1:1 + L] = text[start:start + L] + 1
        start += L
    targets = targets.T                                                     # (S+1, nB)

    at = params['attn']
    pose_dim = num_caps * caps_size
    emb_all = at['char_emb'][jnp.asarray(targets[:num_steps])]              # (S,B,128)
    feats_cat = jnp.concatenate([feats, pose_feat], axis=2)                 # (T,B,640)
    feats_proj = matmul_bias(feats.reshape(T * nB, nC),
                             at['i2h_w']).reshape(T, nB, H)

    w_ctx = at['gru_wih'][:nC + pose_dim]                                   # (640,768)
    w_emb = at['gru_wih'][nC + pose_dim:]                                   # (128,768)
    gi_emb = matmul_bias(emb_all.reshape(num_steps * nB, 128), w_emb,
                         at['gru_bih']).reshape(num_steps, nB, 3 * H)

    hidden_seq = decoder_call(
        gi_emb, feats_proj, feats_cat,
        at['h2h_w'].astype(BF16), at['h2h_b'].reshape(1, H).astype(F32),
        at['score_w'].reshape(1, 1, H).astype(F32),
        w_ctx.astype(BF16), at['gru_whh'].astype(BF16),
        at['gru_bhh'].reshape(1, 3 * H).astype(F32))                        # (S,B,H)

    new_hiddens = jnp.concatenate(
        [hidden_seq[0:int(text_length[bb]), bb, :] for bb in range(nB)], axis=0)
    probs = matmul_bias(new_hiddens, at['gen_w'], at['gen_b'])
    return {'result': probs}


# ---------------------------------------------------------------------------
# Deterministic parameter construction
# ---------------------------------------------------------------------------

_key = [jax.random.PRNGKey(0)]


def rnd(shape, scale=0.1):
    _key[0], sub = jax.random.split(_key[0])
    return scale * jax.random.normal(sub, shape, F32)


def init_params():
    p = {}
    cnn_cfg = [
        (1, planes, 3, (1, 1), (1, 1)),
        (planes, planes * 2, 3, (2, 2), (1, 1)),
        (planes * 2, planes * 2, 3, (1, 1), (1, 1)),
        (planes * 2, planes * 4, 3, (2, 2), (1, 1)),
        (planes * 4, planes * 4, 3, (1, 1), (1, 1)),
        (planes * 4, planes * 8, 3, (2, 1), (1, 1)),
        (planes * 8, planes * 8, 3, (1, 1), (1, 1)),
        (planes * 8, planes * 8, 3, (2, 1), (1, 1)),
        (planes * 8, planes * 8, 2, (1, 1), (0, 0)),
    ]
    p['cnn'] = []
    for cin, cout, k, s, pad in cnn_cfg:
        p['cnn'].append(dict(w=rnd((cout, cin, k, k)),
                             gamma=jnp.ones((cout,), F32),
                             beta=jnp.zeros((cout,), F32),
                             stride=s, pad=pad))
    p['conv_a_w'] = rnd((num_caps, planes * 8, 3, 3))
    p['conv_pose_w'] = rnd((num_caps * caps_size, planes * 8, 3, 3))
    p['bn_a_g'] = jnp.ones((num_caps,), F32)
    p['bn_a_b'] = jnp.zeros((num_caps,), F32)
    p['bn_pose_g'] = jnp.ones((num_caps * caps_size,), F32)
    p['bn_pose_b'] = jnp.zeros((num_caps * caps_size,), F32)

    kkA = 9 * num_caps
    # (torch inits W2/b2 to zero; small random values used so routing is exercised)
    p['route'] = dict(W1=rnd((kkA, num_caps * caps_size, caps_size)),
                      W2=rnd((kkA, num_caps, caps_size)),
                      b2=rnd((1, 1, kkA, num_caps)))
    p['route_bn_g'] = jnp.ones((num_caps * caps_size,), F32)
    p['route_bn_b'] = jnp.zeros((num_caps * caps_size,), F32)

    def lstm_params(nin, H):
        return dict(
            wih_f=rnd((nin, 4 * H)), bih_f=rnd((4 * H,)),
            whh_f=rnd((H, 4 * H)), bhh_f=rnd((4 * H,)),
            wih_b=rnd((nin, 4 * H)), bih_b=rnd((4 * H,)),
            whh_b=rnd((H, 4 * H)), bhh_b=rnd((4 * H,)),
            lin_w=rnd((2 * H, 256)), lin_b=rnd((256,)))

    p['blstm1'] = lstm_params(64, 256)
    p['blstm2'] = lstm_params(256, 256)

    H = 256
    gru_in = 256 + 128 + num_caps * caps_size   # features + embedding + pose = 768
    p['attn'] = dict(
        i2h_w=rnd((256, H)),
        h2h_w=rnd((H, H)), h2h_b=rnd((H,)),
        score_w=rnd((H,)),
        gru_wih=rnd((gru_in, 3 * H)), gru_bih=rnd((3 * H,)),
        gru_whh=rnd((H, 3 * H)), gru_bhh=rnd((3 * H,)),
        char_emb=rnd((N_CLASS + 1, 128), scale=1.0),
        gen_w=rnd((H, N_CLASS)), gen_b=rnd((N_CLASS,)))
    return p


if __name__ == "__main__":
    params = init_params()
    key_in = jax.random.PRNGKey(0)
    # input must have H=32 so the conv stack reduces the height to 1.
    x = jax.random.normal(key_in, (2, 1, 32, 16), F32)
    text_length = np.array([3, 2], np.int32)          # per-sample label lengths
    text = np.array([1, 4, 2, 0, 3], np.int32)        # concatenated labels
    text_rev = text[::-1].copy()                      # unused by forward

    out = rare_forward(params, x, text_length, text, text_rev, test=False)
    probs = jax.block_until_ready(out['result'])
    assert probs.shape == (int(text_length.sum()), N_CLASS)
    assert bool(jnp.all(jnp.isfinite(probs)))
    print("KERNEL_OK")
</pallas_src>

<mosaic_0001>
module attributes {stable_mosaic.version = 11 : i64} {
  func.func @_mm_stats_kernel(%arg0: i32, %arg1: memref<512x9xbf16, #tpu.memory_space<vmem>>, %arg2: memref<9x16xbf16, #tpu.memory_space<vmem>>, %arg3: memref<512x16xf32, #tpu.memory_space<vmem>>, %arg4: memref<1x1x16xf32, #tpu.memory_space<vmem>>, %arg5: memref<1x1x16xf32, #tpu.memory_space<vmem>>) attributes {dimension_semantics = [#tpu.dimension_semantics<parallel>], iteration_bounds = array<i64: 2>, scalar_prefetch = 0 : i64, scratch_operands = 0 : i64, tpu.core_type = #tpu.core_type<tc>, window_params = [{transform_indices = @transform_0, window_bounds = array<i64: 512, 9>}, {pipeline_mode = #tpu.pipeline_mode<synchronous>, transform_indices = @transform_1, window_bounds = array<i64: 9, 16>}, {transform_indices = @transform_2, window_bounds = array<i64: 512, 16>}, {transform_indices = @transform_3, window_bounds = array<i64: 1, 1, 16>}, {transform_indices = @transform_4, window_bounds = array<i64: 1, 1, 16>}]} {
    %c0 = arith.constant 0 : index
    %c0_0 = arith.constant 0 : index
    %0 = vector.load %arg1[%c0, %c0_0] : memref<512x9xbf16, #tpu.memory_space<vmem>>, vector<512x9xbf16>
    %c0_1 = arith.constant 0 : index
    %c0_2 = arith.constant 0 : index
    %1 = vector.load %arg2[%c0_1, %c0_2] : memref<9x16xbf16, #tpu.memory_space<vmem>>, vector<9x16xbf16>
    %cst = arith.constant dense<0.000000e+00> : vector<512x16xf32>
    %2 = tpu.matmul %0, %1, %cst {dimension_numbers = #tpu.dot_dimension_numbers<[1], [0], [0], [1], [0, 0, 1, 1], [], []>} : vector<512x9xbf16>, vector<9x16xbf16>, vector<512x16xf32> -> vector<512x16xf32>
    %c0_3 = arith.constant 0 : index
    %c0_4 = arith.constant 0 : index
    %3 = vector.load %arg3[%c0_3, %c0_4] : memref<512x16xf32, #tpu.memory_space<vmem>>, vector<512x16xf32>
    tpu.vector_store %arg3[%c0_3, %c0_4], %2 {strides = array<i32>} : memref<512x16xf32, #tpu.memory_space<vmem>>, vector<512x16xf32>,
    %cst_5 = arith.constant dense<0.000000e+00> : vector<16xf32>
    %4 = vector.multi_reduction <add>, %2, %cst_5 [0] : vector<512x16xf32> to vector<16xf32>
    %5 = vector.shape_cast %4 : vector<16xf32> to vector<1x16xf32>
    %c0_6 = arith.constant 0 : index
    %c0_7 = arith.constant 0 : index
    %c0_8 = arith.constant 0 : index
    %6 = vector.load %arg4[%c0_6, %c0_7, %c0_8] : memref<1x1x16xf32, #tpu.memory_space<vmem>>, vector<1x1x16xf32>
    %7 = vector.shape_cast %6 : vector<1x1x16xf32> to vector<1x16xf32>
    %8 = vector.shape_cast %5 : vector<1x16xf32> to vector<1x1x16xf32>
    tpu.vector_store %arg4[%c0_6, %c0_7, %c0_8], %8 {strides = array<i32>} : memref<1x1x16xf32, #tpu.memory_space<vmem>>, vector<1x1x16xf32>,
    %9 = arith.mulf %2, %2 : vector<512x16xf32>
    %cst_9 = arith.constant dense<0.000000e+00> : vector<16xf32>
    %10 = vector.multi_reduction <add>, %9, %cst_9 [0] : vector<512x16xf32> to vector<16xf32>
    %11 = vector.shape_cast %10 : vector<16xf32> to vector<1x16xf32>
    %c0_10 = arith.constant 0 : index
    %c0_11 = arith.constant 0 : index
    %c0_12 = arith.constant 0 : index
    %12 = vector.load %arg5[%c0_10, %c0_11, %c0_12] : memref<1x1x16xf32, #tpu.memory_space<vmem>>, vector<1x1x16xf32>
    %13 = vector.shape_cast %12 : vector<1x1x16xf32> to vector<1x16xf32>
    %14 = vector.shape_cast %11 : vector<1x16xf32> to vector<1x1x16xf32>
    tpu.vector_store %arg5[%c0_10, %c0_11, %c0_12], %14 {strides = array<i32>} : memref<1x1x16xf32, #tpu.memory_space<vmem>>, vector<1x1x16xf32>,
    return
  }
  func.func @transform_0(%arg0: i32) -> (i32, i32) {
    %c0_i32 = arith.constant 0 : i32
    %c0_i32_0 = arith.constant 0 : i32
    return %arg0, %c0_i32 : i32, i32
  }
  func.func @transform_1(%arg0: i32) -> (i32, i32) {
    %c0_i32 = arith.constant 0 : i32
    %c0_i32_0 = arith.constant 0 : i32
    %c0_i32_1 = arith.constant 0 : i32
    return %c0_i32, %c0_i32_0 : i32, i32
  }
  func.func @transform_2(%arg0: i32) -> (i32, i32) {
    %c0_i32 = arith.constant 0 : i32
    %c0_i32_0 = arith.constant 0 : i32
    return %arg0, %c0_i32 : i32, i32
  }
  func.func @transform_3(%arg0: i32) -> (i32, i32, i32) {
    %c0_i32 = arith.constant 0 : i32
    %c0_i32_0 = arith.constant 0 : i32
    %c0_i32_1 = arith.constant 0 : i32
    return %arg0, %c0_i32, %c0_i32_0 : i32, i32, i32
  }
  func.func @transform_4(%arg0: i32) -> (i32, i32, i32) {
    %c0_i32 = arith.constant 0 : i32
    %c0_i32_0 = arith.constant 0 : i32
    %c0_i32_1 = arith.constant 0 : i32
    return %arg0, %c0_i32, %c0_i32_0 : i32, i32, i32
  }
}

</mosaic_0001>

<bundles_post_ra>
// kernel: tpu_custom_call.1
= control target key start
LH: loop header
LB: loop body
LE: loop exit
PB: predicated region body
PF: predicated region fallthrough
CT: control target
= control target key end

     0   :  { %10 = vsyncpa [#allocation3], 0  ;;  %s2429_s0 = inlined_call_operand.vmem [shape: bf16[1024,9], index: 0, kind: input, shape index: {}]   ;;  %s2430_s1 = inlined_call_operand.vmem [shape: bf16[9,16], index: 1, kind: input, shape index: {}]   ;;  %s2431_s2 = inlined_call_operand.vmem [shape: f32[1024,16], index: 2, kind: output, shape index: {0}]   ;;  %s2432_s3 = inlined_call_operand.hbm [shape: f32[2,1,16], index: 3, kind: output, shape index: {1}]   ;;  %s2433_s4 = inlined_call_operand.hbm [shape: f32[2,1,16], index: 4, kind: output, shape index: {2}]  }
   0x1   :  { %12 = vsyncpa [#allocation3 + $0x1], 0 }
   0x2   :  { %13 = vsyncpa [#allocation5], 0 }
   0x3   :  { %15 = vsyncpa [#allocation5 + $0x1], 0  ;;  %s1766_s15 = smov 0   ;;  %s1768_s16 = smov 0  }
   0x4   :  { %s1770_s17 = smov 0   ;;  %s1772_s18 = smov 0  }
   0x5 LB: > { %s1787_s19 = sadd.s32 4294967295, %s1736_s18   ;;  %s1390_s20 = sadd.s32 4294967294, %s1736_s18   ;;  %s1736_s18 = sphi %s1772_s18, %s2439_s18   ;;  %s1732_s17 = sphi %s1770_s17, %s2438_s17   ;;  %s1728_s16 = sphi %s1768_s16, %s2437_s16   ;;  %s1724_s15 = sphi %s1766_s15, %s2436_s15  }
   0x6   : > { %s1791_s21 = sadd.s32 1, %s1736_s18   ;;  %s101_s22 = sadd.s32 1, %s1732_s17 }
   0x7   : > { %s98_s23 = ssub.s32 %s1736_s18, %s1791_s21  ;;  %p111_p0 = scmp.ne.s32.totalorder %s1732_s17, %s1728_s16 }
   0x8   : > { %p99_p1 = scmp.eq.s32.totalorder %s98_s23, 0  ;;  %p112_p2 = scmp.eq.s32.totalorder %s1787_s19, 1 }
   0x9   : > { %p117_p3 = scmp.ne.s32.totalorder %s1728_s16, %s1724_s15  ;;  %p118_p4 = scmp.eq.s32.totalorder %s1390_s20, 1 }
   0xa   : > { %s1802_s24 = scalar_select %p99_p1, %s1732_s17, %s101_s22  }
   0xb   : > { %p1804_p5 = por %p112_p2, %p111_p0  ;;  %p1808_p6 = por %p118_p4, %p117_p3 }
   0xc   : > { %p1393_p7 = scmp.ge.s32.totalorder %s1736_s18, 1  ;;  %p174_p8 = scmp.lt.s32.totalorder %s1736_s18, 3 }
   0xe   : > { %p175_p9 = pnand %p1393_p7, %p174_p8 }
   0xf   : > { %s1394_s29 = sshll.u32 (!%p175_p9), %s1787_s19, 6  ;;  %s2345_s12 = sand.u32 (!%p175_p9), 1, %s1728_s16  }
  0x10   : > { %178 = sbr.rel (%p175_p9) target bundleno = 403 (0x193), region = 28  ;;  %p209_p10 = scmp.lt.s32.totalorder (!%p175_p9), %s1394_s29, 127 }
  0x11   : > { %s1463_s13 = sshll.u32 (!%p175_p9), %s1787_s19, 4  ;;  %s201_s14 = scalar_lea.vmem (!%p175_p9), [#allocation2], %s2345_s12 }
  0x12   : > { %s1269_s20 = sshll.u32 (!%p175_p9), %s201_s14, 4  ;;  %s207_s22 = scalar_lea.vmem (!%p175_p9), [#allocation4], %s2345_s12  ;;  %s2357_s20 = int_to_ptr.vmem [resolvable:$true] %s1269_s20 }
  0x13   : > { %s1282_s23 = sshll.u32 (!%p175_p9), %s207_s22, 4  ;;  %s2363_s5 = scalar_lea.hbm (!%p175_p9), %s2433_s4, %s1463_s13  ;;  %s2365_s23 = int_to_ptr.vmem [resolvable:$true] %s1282_s23 }
  0x14   : > { %s1249_s6 = scalar_lea.sflag (!%p175_p9), [#allocation3], %s2345_s12 }
  0x15   : > { %v1613_v0 = vld [vmem:[%s2430_s1] sm:$0x1f]   ;;  %vm549_vm0 = vcmask 1043456   ;;  %vm550_vm1 = vcmask 1044480   ;;  %v1738_v1 = vmov 65535   ;;  %s2441_s29 = smov (!%p209_p10, %s1394_s29), 127 }
  0x16   : > { %v551_v2 = vsel %vm549_vm0, 4294967295, %v1738_v1  ;;  %s1395_s30 = sshll.u32 %s2441_s29, 2  ;;  %vm452_vm2 = vcmask 72704   ;;  %s1397_s8 = sshll.u32 %s2441_s29, 3  ;;  %vm845_vm3 = vcmask 130048   ;;  %vm1043_vm4 = vcmask 122880  }
  0x17   : > { %v552_v3 = vsel %vm550_vm1, %v551_v2, 0  ;;  %s1824_s7 = scalar_lea.vmem %s2429_s0, %s1395_s30  ;;  %s1894_s11 = scalar_lea.vmem %s2431_s2, %s1397_s8 }
  0x18   : > { %v554_v4 = vand.u32 %v1613_v0, %v552_v3  ;;  %v1614_v5 = vld [vmem:[%s1824_s7] sm:$0xff]   ;;  %v1615_v6 = vld [vmem:[%s1824_s7 + $0x8] sm:$0xff]   ;;  %v1616_v7 = vld [vmem:[%s1824_s7 + $0x10] sm:$0xff]   ;;  %s2355_s29 = scalar_lea.hbm %s2432_s3, %s1463_s13  ;;  %s1739_s8 = smov [#allocation2]  }
  0x19   : > { %1502 = vmatprep.mubr.msk.bf16.mxu0 %vm452_vm2, %v1614_v5  ;;  %v1617_v8 = vld [vmem:[%s1824_s7 + $0x18] sm:$0xff]   ;;  %v1618_v9 = vld [vmem:[%s1824_s7 + $0x20] sm:$0xff]   ;;  %v1619_v10 = vld [vmem:[%s1824_s7 + $0x28] sm:$0xff]   ;;  %s1650_s9 = sshll.u32 %s1739_s8, 4  ;;  %s1651_s9 = int_to_ptr.vmem [resolvable:$false] %s1650_s9 }
  0x1a   : > { %1500 = vmatprep.subr.bf16.mxu0 %v554_v4  ;;  %1566 = vmatprep.subr.bf16.mxu1 %v554_v4  ;;  %v1620_v11 = vld [vmem:[%s1824_s7 + $0x30] sm:$0xff]   ;;  %v1630_v12 = vld [vmem:[%s1824_s7 + $0x80] sm:$0xff]   ;;  %v1631_v13 = vld [vmem:[%s1824_s7 + $0x88] sm:$0xff]   ;;  %s1652_s10 = scalar_lea.vmem %s1651_s9, 32  ;;  %p1653_p0 = scmp.lt.s32.totalorder %s2357_s20, %s1651_s9 }
  0x1b   : > { %1501 = vmatpush3.bf16.msra.mxu0 %v554_v4  ;;  %1567 = vmatpush3.bf16.msra.mxu1 %v554_v4  ;;  %v1632_v14 = vld [vmem:[%s1824_s7 + $0x90] sm:$0xff]   ;;  %v1621_v15 = vld [vmem:[%s1824_s7 + $0x38] sm:$0xff]   ;;  %v1622_v16 = vld [vmem:[%s1824_s7 + $0x40] sm:$0xff]  }
  0x1c   : > { %1534 = vmatprep.mubr.msk.bf16.mxu1 %vm452_vm2, %v1630_v12  ;;  %v1633_v17 = vld [vmem:[%s1824_s7 + $0x98] sm:$0xff]   ;;  %v1634_v18 = vld [vmem:[%s1824_s7 + $0xa0] sm:$0xff]   ;;  %v1623_v19 = vld [vmem:[%s1824_s7 + $0x48] sm:$0xff]  }
  0x1d   : > { %v1635_v20 = vld [vmem:[%s1824_s7 + $0xa8] sm:$0xff]   ;;  %v1624_v21 = vld [vmem:[%s1824_s7 + $0x50] sm:$0xff]   ;;  %v1625_v23 = vld [vmem:[%s1824_s7 + $0x58] sm:$0xff]  }
  0x1e   : > { %1503 = vmatmul.mubr.msk.bf16.vlgmr.msra.gmra.mxu0 %vm452_vm2, %v1615_v6  ;;  %1535 = vmatmul.mubr.msk.bf16.vlgmr.msra.gmra.mxu1 %vm452_vm2, %v1631_v13  ;;  %v1636_v22 = vld [vmem:[%s1824_s7 + $0xb0] sm:$0xff]   ;;  %v1637_v24 = vld [vmem:[%s1824_s7 + $0xb8] sm:$0xff]   ;;  %v1626_v25 = vld [vmem:[%s1824_s7 + $0x60] sm:$0xff]  }
  0x1f   : > { %1506 = vmatprep.mubr.msk.bf16.mxu0 %vm452_vm2, %v1616_v7  ;;  %1538 = vmatprep.mubr.msk.bf16.mxu1 %vm452_vm2, %v1632_v14  ;;  %v1638_v26 = vld [vmem:[%s1824_s7 + $0xc0] sm:$0xff]   ;;  %v1627_v27 = vld [vmem:[%s1824_s7 + $0x68] sm:$0xff]   ;;  %v1628_v29 = vld [vmem:[%s1824_s7 + $0x70] sm:$0xff]  }
  0x20   : > { %v1639_v28 = vld [vmem:[%s1824_s7 + $0xc8] sm:$0xff]   ;;  %v1640_v30 = vld [vmem:[%s1824_s7 + $0xd0] sm:$0xff]   ;;  %v1629_v31 = vld [vmem:[%s1824_s7 + $0x78] sm:$0xff]  }
  0x21   : > { %v1641_v32 = vld [vmem:[%s1824_s7 + $0xd8] sm:$0xff]   ;;  %v1642_v33 = vld [vmem:[%s1824_s7 + $0xe0] sm:$0xff]   ;;  %v1643_v34 = vld [vmem:[%s1824_s7 + $0xe8] sm:$0xff]  }
  0x22   : > { %v1644_v35 = vld [vmem:[%s1824_s7 + $0xf0] sm:$0xff]   ;;  %v1645_v36 = vld [vmem:[%s1824_s7 + $0xf8] sm:$0xff]   ;;  %s1646_s7 = scalar_lea.vmem %s2357_s20, 16 }
  0x23   : > { %p1647_p11 = scmp.ne.s32.totalorder %s2357_s20, %s1646_s7  ;;  %p1654_p1 = scmp.lt.s32.totalorder %s1652_s10, %s1646_s7 }
  0x25   : > { %p1648_p12 = pnand %p1647_p11, %p1804_p5  ;;  %p1655_p2 = por %p1654_p1, %p1653_p0 }
  0x26   : > { %1507 = vmatmul.mubr.msk.bf16.gmra.mxu0 %vm452_vm2, %v1617_v8  ;;  %1539 = vmatmul.mubr.msk.bf16.gmra.mxu1 %vm452_vm2, %v1633_v17 }
  0x27   : > { %1510 = vmatprep.mubr.msk.bf16.mxu0 %vm452_vm2, %v1618_v9  ;;  %1542 = vmatprep.mubr.msk.bf16.mxu1 %vm452_vm2, %v1634_v18  ;;  %p1649_p13 = pneg %p1648_p12 }
  0x29   : > { %p1656_p3 = pnand %p1655_p2, %p1649_p13 }
  0x2e   : > { %1511 = vmatmul.mubr.msk.bf16.gmra.mxu0 %vm452_vm2, %v1619_v10  ;;  %1543 = vmatmul.mubr.msk.bf16.gmra.mxu1 %vm452_vm2, %v1635_v20 }
  0x2f   : > { %1514 = vmatprep.mubr.msk.bf16.mxu0 %vm452_vm2, %v1620_v11  ;;  %1546 = vmatprep.mubr.msk.bf16.mxu1 %vm452_vm2, %v1636_v22 }
  0x36   : > { %1515 = vmatmul.mubr.msk.bf16.gmra.mxu0 %vm452_vm2, %v1621_v15  ;;  %1547 = vmatmul.mubr.msk.bf16.gmra.mxu1 %vm452_vm2, %v1637_v24 }
  0x37   : > { %1518 = vmatprep.mubr.msk.bf16.mxu0 %vm452_vm2, %v1622_v16  ;;  %1550 = vmatprep.mubr.msk.bf16.mxu1 %vm452_vm2, %v1638_v26 }
  0x3e   : > { %1519 = vmatmul.mubr.msk.bf16.gmra.mxu0 %vm452_vm2, %v1623_v19  ;;  %1551 = vmatmul.mubr.msk.bf16.gmra.mxu1 %vm452_vm2, %v1639_v28 }
  0x3f   : > { %1522 = vmatprep.mubr.msk.bf16.mxu0 %vm452_vm2, %v1624_v21  ;;  %1554 = vmatprep.mubr.msk.bf16.mxu1 %vm452_vm2, %v1640_v30 }
  0x46   : > { %1523 = vmatmul.mubr.msk.bf16.gmra.mxu0 %vm452_vm2, %v1625_v23  ;;  %1555 = vmatmul.mubr.msk.bf16.gmra.mxu1 %vm452_vm2, %v1641_v32 }
  0x47   : > { %1526 = vmatprep.mubr.msk.bf16.mxu0 %vm452_vm2, %v1626_v25  ;;  %1558 = vmatprep.mubr.msk.bf16.mxu1 %vm452_vm2, %v1642_v33 }
  0x4e   : > { %1527 = vmatmul.mubr.msk.bf16.gmra.mxu0 %vm452_vm2, %v1627_v27  ;;  %1559 = vmatmul.mubr.msk.bf16.gmra.mxu1 %vm452_vm2, %v1643_v34 }
  0x4f   : > { %1530 = vmatprep.mubr.msk.bf16.mxu0 %vm452_vm2, %v1628_v29  ;;  %1562 = vmatprep.mubr.msk.bf16.mxu1 %vm452_vm2, %v1644_v35 }
  0x56   : > { %1531 = vmatmul.mubr.msk.bf16.gmra.mxu0 %vm452_vm2, %v1629_v31  ;;  %1563 = vmatmul.mubr.msk.bf16.gmra.mxu1 %vm452_vm2, %v1645_v36 }
  0xde   : > { %v1504_v37 = vpop.f32.mrf.mxu0  ;;  %v1923_v9 = vpop.f32.mrf.mxu1 }
  0xdf   : > { %848 = vst.msk [vmem:[%s1894_s11 + $0x10] sm:$0xff] %vm845_vm3, %v1504_v37  ;;  %v1047_v42 = vmul.f32 %v1504_v37, %v1504_v37  ;;  %v913_v48 = vsel %vm845_vm3, %v1504_v37, 0.0  ;;  %880 = vst.msk [vmem:[%s1894_s11 + $0x110] sm:$0xff] %vm845_vm3, %v1923_v9 }
  0xe0   : > { %v590_v38 = vpop.f32.mrf.mxu0  ;;  %v1932_v16 = vpop.f32.mrf.mxu1 }
  0xe1   : > { %846 = vst.msk [vmem:[%s1894_s11] sm:$0xff] %vm845_vm3, %v590_v38  ;;  %v1045_v40 = vmul.f32 %v590_v38, %v590_v38  ;;  %v910_v43 = vsel %vm845_vm3, %v590_v38, 0.0  ;;  %v1112_v55 = vsel %vm845_vm3, %v1047_v42, 0.0  ;;  %878 = vst.msk [vmem:[%s1894_s11 + $0x100] sm:$0xff] %vm845_vm3, %v1932_v16 }
  0xe2   : > { %v1505_v39 = vpop.f32.mrf.mxu0  ;;  %v1941_v23 = vpop.f32.mrf.mxu1 }
  0xe3   : > { %849 = vst.msk [vmem:[%s1894_s11 + $0x18] sm:$0xff] %vm845_vm3, %v1505_v39  ;;  %v1109_v49 = vsel %vm845_vm3, %v1045_v40, 0.0  ;;  %v1048_v50 = vmul.f32 %v1505_v39, %v1505_v39  ;;  %v915_v56 = vsel %vm845_vm3, %v1505_v39, 0.0  ;;  %881 = vst.msk [vmem:[%s1894_s11 + $0x118] sm:$0xff] %vm845_vm3, %v1941_v23 }
  0xe4   : > { %v593_v41 = vpop.f32.mrf.mxu0  ;;  %v1950_v29 = vpop.f32.mrf.mxu1 }
  0xe5   : > { %847 = vst.msk [vmem:[%s1894_s11 + $0x8] sm:$0xff] %vm845_vm3, %v593_v41  ;;  %v911_v44 = vsel %vm845_vm3, %v593_v41, 0.0  ;;  %v1046_v45 = vmul.f32 %v593_v41, %v593_v41  ;;  %v1114_v61 = vsel %vm845_vm3, %v1048_v50, 0.0  ;;  %879 = vst.msk [vmem:[%s1894_s11 + $0x108] sm:$0xff] %vm845_vm3, %v1950_v29 }
  0xe6   : > { %v912_v46 = vadd.f32 %v911_v44, %v910_v43  ;;  %v1508_v47 = vpop.f32.mrf.mxu0  ;;  %v1959_v37 = vpop.f32.mrf.mxu1 }
  0xe7   : > { %v1110_v51 = vsel %vm845_vm3, %v1046_v45, 0.0  ;;  %852 = vst.msk [vmem:[%s1894_s11 + $0x30] sm:$0xff] %vm845_vm3, %v1508_v47  ;;  %v1051_v2 = vmul.f32 %v1508_v47, %v1508_v47  ;;  %v921_v10 = vsel %vm845_vm3, %v1508_v47, 0.0  ;;  %884 = vst.msk [vmem:[%s1894_s11 + $0x130] sm:$0xff] %vm845_vm3, %v1959_v37 }
  0xe8   : > { %v914_v52 = vadd.f32 %v913_v48, %v912_v46  ;;  %v1111_v53 = vadd.f32 %v1110_v51, %v1109_v49  ;;  %v606_v54 = vpop.f32.mrf.mxu0  ;;  %v1968_v44 = vpop.f32.mrf.mxu1 }
  0xe9   : > { %850 = vst.msk [vmem:[%s1894_s11 + $0x20] sm:$0xff] %vm845_vm3, %v606_v54  ;;  %v1049_v57 = vmul.f32 %v606_v54, %v606_v54  ;;  %v917_v62 = vsel %vm845_vm3, %v606_v54, 0.0  ;;  %v1120_v17 = vsel %vm845_vm3, %v1051_v2, 0.0  ;;  %882 = vst.msk [vmem:[%s1894_s11 + $0x120] sm:$0xff] %vm845_vm3, %v1968_v44 }
  0xea   : > { %v1113_v58 = vadd.f32 %v1112_v55, %v1111_v53  ;;  %v916_v59 = vadd.f32 %v915_v56, %v914_v52  ;;  %v1509_v60 = vpop.f32.mrf.mxu0  ;;  %v1977_v51 = vpop.f32.mrf.mxu1 }
  0xeb   : > { %853 = vst.msk [vmem:[%s1894_s11 + $0x38] sm:$0xff] %vm845_vm3, %v1509_v60  ;;  %v1116_v3 = vsel %vm845_vm3, %v1049_v57, 0.0  ;;  %v1052_v11 = vmul.f32 %v1509_v60, %v1509_v60  ;;  %v923_v18 = vsel %vm845_vm3, %v1509_v60, 0.0  ;;  %885 = vst.msk [vmem:[%s1894_s11 + $0x138] sm:$0xff] %vm845_vm3, %v1977_v51 }
  0xec   : > { %v918_v63 = vadd.f32 %v917_v62, %v916_v59  ;;  %v1115_v0 = vadd.f32 %v1114_v61, %v1113_v58  ;;  %v609_v1 = vpop.f32.mrf.mxu0  ;;  %v1986_v57 = vpop.f32.mrf.mxu1 }
  0xed   : > { %851 = vst.msk [vmem:[%s1894_s11 + $0x28] sm:$0xff] %vm845_vm3, %v609_v1  ;;  %v919_v4 = vsel %vm845_vm3, %v609_v1, 0.0  ;;  %v1050_v5 = vmul.f32 %v609_v1, %v609_v1  ;;  %v1122_v24 = vsel %vm845_vm3, %v1052_v11, 0.0  ;;  %883 = vst.msk [vmem:[%s1894_s11 + $0x128] sm:$0xff] %vm845_vm3, %v1986_v57 }
  0xee   : > { %v1117_v6 = vadd.f32 %v1116_v3, %v1115_v0  ;;  %v920_v7 = vadd.f32 %v919_v4, %v918_v63  ;;  %v1512_v8 = vpop.f32.mrf.mxu0  ;;  %v1995_v1 = vpop.f32.mrf.mxu1 }
  0xef   : > { %v1118_v12 = vsel %vm845_vm3, %v1050_v5, 0.0  ;;  %856 = vst.msk [vmem:[%s1894_s11 + $0x50] sm:$0xff] %vm845_vm3, %v1512_v8  ;;  %v1055_v30 = vmul.f32 %v1512_v8, %v1512_v8  ;;  %v929_v38 = vsel %vm845_vm3, %v1512_v8, 0.0  ;;  %888 = vst.msk [vmem:[%s1894_s11 + $0x150] sm:$0xff] %vm845_vm3, %v1995_v1 }
  0xf0   : > { %v922_v13 = vadd.f32 %v921_v10, %v920_v7  ;;  %v1119_v14 = vadd.f32 %v1118_v12, %v1117_v6  ;;  %v622_v15 = vpop.f32.mrf.mxu0  ;;  %v2004_v8 = vpop.f32.mrf.mxu1 }
  0xf1   : > { %854 = vst.msk [vmem:[%s1894_s11 + $0x40] sm:$0xff] %vm845_vm3, %v622_v15  ;;  %v1053_v19 = vmul.f32 %v622_v15, %v622_v15  ;;  %v925_v25 = vsel %vm845_vm3, %v622_v15, 0.0  ;;  %v1128_v45 = vsel %vm845_vm3, %v1055_v30, 0.0  ;;  %886 = vst.msk [vmem:[%s1894_s11 + $0x140] sm:$0xff] %vm845_vm3, %v2004_v8 }
  0xf2   : > { %v1121_v20 = vadd.f32 %v1120_v17, %v1119_v14  ;;  %v924_v21 = vadd.f32 %v923_v18, %v922_v13  ;;  %v1513_v22 = vpop.f32.mrf.mxu0  ;;  %v2013_v17 = vpop.f32.mrf.mxu1 }
  0xf3   : > { %857 = vst.msk [vmem:[%s1894_s11 + $0x58] sm:$0xff] %vm845_vm3, %v1513_v22  ;;  %v1124_v31 = vsel %vm845_vm3, %v1053_v19, 0.0  ;;  %v1056_v39 = vmul.f32 %v1513_v22, %v1513_v22  ;;  %v931_v46 = vsel %vm845_vm3, %v1513_v22, 0.0  ;;  %889 = vst.msk [vmem:[%s1894_s11 + $0x158] sm:$0xff] %vm845_vm3, %v2013_v17 }
  0xf4   : > { %v926_v26 = vadd.f32 %v925_v25, %v924_v21  ;;  %v1123_v27 = vadd.f32 %v1122_v24, %v1121_v20  ;;  %v625_v28 = vpop.f32.mrf.mxu0  ;;  %v2022_v24 = vpop.f32.mrf.mxu1 }
  0xf5   : > { %855 = vst.msk [vmem:[%s1894_s11 + $0x48] sm:$0xff] %vm845_vm3, %v625_v28  ;;  %v927_v32 = vsel %vm845_vm3, %v625_v28, 0.0  ;;  %v1054_v33 = vmul.f32 %v625_v28, %v625_v28  ;;  %v1130_v52 = vsel %vm845_vm3, %v1056_v39, 0.0  ;;  %887 = vst.msk [vmem:[%s1894_s11 + $0x148] sm:$0xff] %vm845_vm3, %v2022_v24 }
  0xf6   : > { %v1125_v34 = vadd.f32 %v1124_v31, %v1123_v27  ;;  %v928_v35 = vadd.f32 %v927_v32, %v926_v26  ;;  %v1516_v36 = vpop.f32.mrf.mxu0 }
  0xf7   : > { %v1126_v40 = vsel %vm845_vm3, %v1054_v33, 0.0  ;;  %860 = vst.msk [vmem:[%s1894_s11 + $0x70] sm:$0xff] %vm845_vm3, %v1516_v36  ;;  %v1059_v58 = vmul.f32 %v1516_v36, %v1516_v36  ;;  %v937_v2 = vsel %vm845_vm3, %v1516_v36, 0.0  ;;  %v2031_v33 = vpop.f32.mrf.mxu1 }
  0xf8   : > { %v930_v41 = vadd.f32 %v929_v38, %v928_v35  ;;  %v1127_v42 = vadd.f32 %v1126_v40, %v1125_v34  ;;  %v638_v43 = vpop.f32.mrf.mxu0  ;;  %892 = vst.msk [vmem:[%s1894_s11 + $0x170] sm:$0xff] %vm845_vm3, %v2031_v33 }
  0xf9   : > { %858 = vst.msk [vmem:[%s1894_s11 + $0x60] sm:$0xff] %vm845_vm3, %v638_v43  ;;  %v1057_v47 = vmul.f32 %v638_v43, %v638_v43  ;;  %v933_v53 = vsel %vm845_vm3, %v638_v43, 0.0  ;;  %v1136_v10 = vsel %vm845_vm3, %v1059_v58, 0.0 }
  0xfa   : > { %v1129_v48 = vadd.f32 %v1128_v45, %v1127_v42  ;;  %v932_v49 = vadd.f32 %v931_v46, %v930_v41  ;;  %v1517_v50 = vpop.f32.mrf.mxu0  ;;  %v2040_v41 = vpop.f32.mrf.mxu1 }
  0xfb   : > { %861 = vst.msk [vmem:[%s1894_s11 + $0x78] sm:$0xff] %vm845_vm3, %v1517_v50  ;;  %v1132_v59 = vsel %vm845_vm3, %v1057_v47, 0.0  ;;  %v1060_v3 = vmul.f32 %v1517_v50, %v1517_v50  ;;  %v939_v11 = vsel %vm845_vm3, %v1517_v50, 0.0  ;;  %890 = vst.msk [vmem:[%s1894_s11 + $0x160] sm:$0xff] %vm845_vm3, %v2040_v41 }
  0xfc   : > { %v934_v54 = vadd.f32 %v933_v53, %v932_v49  ;;  %v1131_v55 = vadd.f32 %v1130_v52, %v1129_v48  ;;  %v641_v56 = vpop.f32.mrf.mxu0  ;;  %v2049_v49 = vpop.f32.mrf.mxu1 }
  0xfd   : > { %859 = vst.msk [vmem:[%s1894_s11 + $0x68] sm:$0xff] %vm845_vm3, %v641_v56  ;;  %v935_v60 = vsel %vm845_vm3, %v641_v56, 0.0  ;;  %v1058_v61 = vmul.f32 %v641_v56, %v641_v56  ;;  %v1138_v18 = vsel %vm845_vm3, %v1060_v3, 0.0  ;;  %893 = vst.msk [vmem:[%s1894_s11 + $0x178] sm:$0xff] %vm845_vm3, %v2049_v49 }
  0xfe   : > { %v1133_v62 = vadd.f32 %v1132_v59, %v1131_v55  ;;  %v936_v63 = vadd.f32 %v935_v60, %v934_v54  ;;  %v1520_v0 = vpop.f32.mrf.mxu0  ;;  %v2058_v56 = vpop.f32.mrf.mxu1 }
  0xff   : > { %v1134_v4 = vsel %vm845_vm3, %v1058_v61, 0.0  ;;  %864 = vst.msk [vmem:[%s1894_s11 + $0x90] sm:$0xff] %vm845_vm3, %v1520_v0  ;;  %v1063_v25 = vmul.f32 %v1520_v0, %v1520_v0  ;;  %v945_v34 = vsel %vm845_vm3, %v1520_v0, 0.0  ;;  %891 = vst.msk [vmem:[%s1894_s11 + $0x168] sm:$0xff] %vm845_vm3, %v2058_v56 }
 0x100   : > { %v938_v5 = vadd.f32 %v937_v2, %v936_v63  ;;  %v1135_v6 = vadd.f32 %v1134_v4, %v1133_v62  ;;  %v654_v7 = vpop.f32.mrf.mxu0  ;;  %v2067_v2 = vpop.f32.mrf.mxu1 }
 0x101   : > { %862 = vst.msk [vmem:[%s1894_s11 + $0x80] sm:$0xff] %vm845_vm3, %v654_v7  ;;  %v1061_v12 = vmul.f32 %v654_v7, %v654_v7  ;;  %v941_v19 = vsel %vm845_vm3, %v654_v7, 0.0  ;;  %v1144_v42 = vsel %vm845_vm3, %v1063_v25, 0.0  ;;  %896 = vst.msk [vmem:[%s1894_s11 + $0x190] sm:$0xff] %vm845_vm3, %v2067_v2 }
 0x102   : > { %v1137_v13 = vadd.f32 %v1136_v10, %v1135_v6  ;;  %v940_v14 = vadd.f32 %v939_v11, %v938_v5  ;;  %v1521_v15 = vpop.f32.mrf.mxu0  ;;  %v2076_v11 = vpop.f32.mrf.mxu1 }
 0x103   : > { %865 = vst.msk [vmem:[%s1894_s11 + $0x98] sm:$0xff] %vm845_vm3, %v1521_v15  ;;  %v1140_v26 = vsel %vm845_vm3, %v1061_v12, 0.0  ;;  %v1064_v35 = vmul.f32 %v1521_v15, %v1521_v15  ;;  %v947_v43 = vsel %vm845_vm3, %v1521_v15, 0.0  ;;  %894 = vst.msk [vmem:[%s1894_s11 + $0x180] sm:$0xff] %vm845_vm3, %v2076_v11 }
 0x104   : > { %v942_v20 = vadd.f32 %v941_v19, %v940_v14  ;;  %v1139_v21 = vadd.f32 %v1138_v18, %v1137_v13  ;;  %v657_v22 = vpop.f32.mrf.mxu0 }
 0x105   : > { %863 = vst.msk [vmem:[%s1894_s11 + $0x88] sm:$0xff] %vm845_vm3, %v657_v22  ;;  %v943_v27 = vsel %vm845_vm3, %v657_v22, 0.0  ;;  %v1062_v28 = vmul.f32 %v657_v22, %v657_v22  ;;  %v1146_v50 = vsel %vm845_vm3, %v1064_v35, 0.0 }
 0x106   : > { %v1141_v30 = vadd.f32 %v1140_v26, %v1139_v21  ;;  %v944_v31 = vadd.f32 %v943_v27, %v942_v20  ;;  %v1524_v32 = vpop.f32.mrf.mxu0  ;;  %v2085_v20 = vpop.f32.mrf.mxu1 }
 0x107   : > { %v1142_v36 = vsel %vm845_vm3, %v1062_v28, 0.0  ;;  %868 = vst.msk [vmem:[%s1894_s11 + $0xb0] sm:$0xff] %vm845_vm3, %v1524_v32  ;;  %v1067_v58 = vmul.f32 %v1524_v32, %v1524_v32  ;;  %v953_v3 = vsel %vm845_vm3, %v1524_v32, 0.0  ;;  %897 = vst.msk [vmem:[%s1894_s11 + $0x198] sm:$0xff] %vm845_vm3, %v2085_v20 }
 0x108   : > { %v946_v38 = vadd.f32 %v945_v34, %v944_v31  ;;  %v1143_v39 = vadd.f32 %v1142_v36, %v1141_v30  ;;  %v670_v40 = vpop.f32.mrf.mxu0  ;;  %v2094_v28 = vpop.f32.mrf.mxu1 }
 0x109   : > { %866 = vst.msk [vmem:[%s1894_s11 + $0xa0] sm:$0xff] %vm845_vm3, %v670_v40  ;;  %v1065_v45 = vmul.f32 %v670_v40, %v670_v40  ;;  %v949_v52 = vsel %vm845_vm3, %v670_v40, 0.0  ;;  %v1152_v12 = vsel %vm845_vm3, %v1067_v58, 0.0  ;;  %895 = vst.msk [vmem:[%s1894_s11 + $0x188] sm:$0xff] %vm845_vm3, %v2094_v28 }
 0x10a   : > { %v1145_v46 = vadd.f32 %v1144_v42, %v1143_v39  ;;  %v948_v47 = vadd.f32 %v947_v43, %v946_v38  ;;  %v1525_v48 = vpop.f32.mrf.mxu0  ;;  %v2103_v39 = vpop.f32.mrf.mxu1 }
 0x10b   : > { %869 = vst.msk [vmem:[%s1894_s11 + $0xb8] sm:$0xff] %vm845_vm3, %v1525_v48  ;;  %v1148_v59 = vsel %vm845_vm3, %v1065_v45, 0.0  ;;  %v1068_v4 = vmul.f32 %v1525_v48, %v1525_v48  ;;  %v955_v13 = vsel %vm845_vm3, %v1525_v48, 0.0  ;;  %900 = vst.msk [vmem:[%s1894_s11 + $0x1b0] sm:$0xff] %vm845_vm3, %v2103_v39 }
 0x10c   : > { %v950_v53 = vadd.f32 %v949_v52, %v948_v47  ;;  %v1147_v54 = vadd.f32 %v1146_v50, %v1145_v46  ;;  %v673_v55 = vpop.f32.mrf.mxu0  ;;  %v2112_v48 = vpop.f32.mrf.mxu1 }
 0x10d   : > { %867 = vst.msk [vmem:[%s1894_s11 + $0xa8] sm:$0xff] %vm845_vm3, %v673_v55  ;;  %v951_v60 = vsel %vm845_vm3, %v673_v55, 0.0  ;;  %v1066_v61 = vmul.f32 %v673_v55, %v673_v55  ;;  %v1154_v21 = vsel %vm845_vm3, %v1068_v4, 0.0  ;;  %898 = vst.msk [vmem:[%s1894_s11 + $0x1a0] sm:$0xff] %vm845_vm3, %v2112_v48 }
 0x10e   : > { %v1149_v62 = vadd.f32 %v1148_v59, %v1147_v54  ;;  %v952_v63 = vadd.f32 %v951_v60, %v950_v53  ;;  %v1528_v0 = vpop.f32.mrf.mxu0  ;;  %v2121_v59 = vpop.f32.mrf.mxu1 }
 0x10f   : > { %v1150_v5 = vsel %vm845_vm3, %v1066_v61, 0.0  ;;  %872 = vst.msk [vmem:[%s1894_s11 + $0xd0] sm:$0xff] %vm845_vm3, %v1528_v0  ;;  %v1071_v30 = vmul.f32 %v1528_v0, %v1528_v0  ;;  %v961_v40 = vsel %vm845_vm3, %v1528_v0, 0.0  ;;  %901 = vst.msk [vmem:[%s1894_s11 + $0x1b8] sm:$0xff] %vm845_vm3, %v2121_v59 }
 0x110   : > { %v954_v6 = vadd.f32 %v953_v3, %v952_v63  ;;  %v1151_v7 = vadd.f32 %v1150_v5, %v1149_v62  ;;  %v686_v10 = vpop.f32.mrf.mxu0  ;;  %v2130_v3 = vpop.f32.mrf.mxu1 }
 0x111   : > { %870 = vst.msk [vmem:[%s1894_s11 + $0xc0] sm:$0xff] %vm845_vm3, %v686_v10  ;;  %v1069_v14 = vmul.f32 %v686_v10, %v686_v10  ;;  %v957_v22 = vsel %vm845_vm3, %v686_v10, 0.0  ;;  %v1160_v50 = vsel %vm845_vm3, %v1071_v30, 0.0  ;;  %899 = vst.msk [vmem:[%s1894_s11 + $0x1a8] sm:$0xff] %vm845_vm3, %v2130_v3 }
 0x112   : > { %v1153_v15 = vadd.f32 %v1152_v12, %v1151_v7  ;;  %v956_v18 = vadd.f32 %v955_v13, %v954_v6  ;;  %v1529_v19 = vpop.f32.mrf.mxu0  ;;  %v2139_v13 = vpop.f32.mrf.mxu1 }
 0x113   : > { %873 = vst.msk [vmem:[%s1894_s11 + $0xd8] sm:$0xff] %vm845_vm3, %v1529_v19  ;;  %v1156_v31 = vsel %vm845_vm3, %v1069_v14, 0.0  ;;  %v1072_v42 = vmul.f32 %v1529_v19, %v1529_v19  ;;  %v963_v52 = vsel %vm845_vm3, %v1529_v19, 0.0  ;;  %904 = vst.msk [vmem:[%s1894_s11 + $0x1d0] sm:$0xff] %vm845_vm3, %v2139_v13 }
 0x114   : > { %v958_v25 = vadd.f32 %v957_v22, %v956_v18  ;;  %v1155_v26 = vadd.f32 %v1154_v21, %v1153_v15  ;;  %v689_v27 = vpop.f32.mrf.mxu0  ;;  %v2146_v22 = vpop.f32.mrf.mxu1 }
 0x115   : > { %871 = vst.msk [vmem:[%s1894_s11 + $0xc8] sm:$0xff] %vm845_vm3, %v689_v27  ;;  %v959_v32 = vsel %vm845_vm3, %v689_v27, 0.0  ;;  %v1070_v34 = vmul.f32 %v689_v27, %v689_v27  ;;  %v1162_v60 = vsel %vm845_vm3, %v1072_v42, 0.0  ;;  %v1077_v27 = vmul.f32 %v1932_v16, %v1932_v16  ;;  %902 = vst.msk [vmem:[%s1894_s11 + $0x1c0] sm:$0xff] %vm845_vm3, %v2146_v22 }
 0x116   : > { %v1157_v35 = vadd.f32 %v1156_v31, %v1155_v26  ;;  %v960_v36 = vadd.f32 %v959_v32, %v958_v25  ;;  %v1532_v38 = vpop.f32.mrf.mxu0  ;;  %v2155_v32 = vpop.f32.mrf.mxu1 }
 0x117   : > { %v1158_v43 = vsel %vm845_vm3, %v1070_v34, 0.0  ;;  %876 = vst.msk [vmem:[%s1894_s11 + $0xf0] sm:$0xff] %vm845_vm3, %v1532_v38  ;;  %v1075_v4 = vmul.f32 %v1532_v38, %v1532_v38  ;;  %v969_v14 = vsel %vm845_vm3, %v1532_v38, 0.0  ;;  %905 = vst.msk [vmem:[%s1894_s11 + $0x1d8] sm:$0xff] %vm845_vm3, %v2155_v32 }
 0x118   : > { %v962_v45 = vadd.f32 %v961_v40, %v960_v36  ;;  %v1159_v46 = vadd.f32 %v1158_v43, %v1157_v35  ;;  %v702_v47 = vpop.f32.mrf.mxu0  ;;  %v973_v35 = vsel %vm845_vm3, %v1932_v16, 0.0  ;;  %v1078_v36 = vmul.f32 %v1950_v29, %v1950_v29  ;;  %v2165_v42 = vpop.f32.mrf.mxu1 }
 0x119   : > { %874 = vst.msk [vmem:[%s1894_s11 + $0xe0] sm:$0xff] %vm845_vm3, %v702_v47  ;;  %v1073_v53 = vmul.f32 %v702_v47, %v702_v47  ;;  %v965_v61 = vsel %vm845_vm3, %v702_v47, 0.0  ;;  %v1168_v25 = vsel %vm845_vm3, %v1075_v4, 0.0  ;;  %v1079_v43 = vmul.f32 %v1923_v9, %v1923_v9  ;;  %903 = vst.msk [vmem:[%s1894_s11 + $0x1c8] sm:$0xff] %vm845_vm3, %v2165_v42 }
 0x11a   : > { %v1161_v54 = vadd.f32 %v1160_v50, %v1159_v46  ;;  %v964_v55 = vadd.f32 %v963_v52, %v962_v45  ;;  %v1533_v58 = vpop.f32.mrf.mxu0  ;;  %v1172_v45 = vsel %vm845_vm3, %v1077_v27, 0.0  ;;  %v975_v16 = vsel %vm845_vm3, %v1950_v29, 0.0  ;;  %v2175_v50 = vpop.f32.mrf.mxu1 }
 0x11b   : > { %877 = vst.msk [vmem:[%s1894_s11 + $0xf8] sm:$0xff] %vm845_vm3, %v1533_v58  ;;  %v1164_v5 = vsel %vm845_vm3, %v1073_v53, 0.0  ;;  %v1076_v15 = vmul.f32 %v1533_v58, %v1533_v58  ;;  %v971_v26 = vsel %vm845_vm3, %v1533_v58, 0.0  ;;  %v977_v52 = vsel %vm845_vm3, %v1923_v9, 0.0  ;;  %908 = vst.msk [vmem:[%s1894_s11 + $0x1f0] sm:$0xff] %vm845_vm3, %v2175_v50 }
 0x11c   : > { %v966_v62 = vadd.f32 %v965_v61, %v964_v55  ;;  %v1163_v63 = vadd.f32 %v1162_v60, %v1161_v54  ;;  %v705_v0 = vpop.f32.mrf.mxu0  ;;  %v1080_v53 = vmul.f32 %v1941_v23, %v1941_v23  ;;  %v1174_v54 = vsel %vm845_vm3, %v1078_v36, 0.0  ;;  %v2185_v58 = vpop.f32.mrf.mxu1 }
 0x11d   : > { %875 = vst.msk [vmem:[%s1894_s11 + $0xe8] sm:$0xff] %vm845_vm3, %v705_v0  ;;  %v967_v6 = vsel %vm845_vm3, %v705_v0, 0.0  ;;  %v1074_v7 = vmul.f32 %v705_v0, %v705_v0  ;;  %v1170_v34 = vsel %vm845_vm3, %v1076_v15, 0.0  ;;  %v1176_v60 = vsel %vm845_vm3, %v1079_v43, 0.0  ;;  %906 = vst.msk [vmem:[%s1894_s11 + $0x1e0] sm:$0xff] %vm845_vm3, %v2185_v58 }
 0x11e   : > { %v1165_v10 = vadd.f32 %v1164_v5, %v1163_v63  ;;  %v968_v12 = vadd.f32 %v967_v6, %v966_v62  ;;  %v979_v61 = vsel %vm845_vm3, %v1941_v23, 0.0  ;;  %v1081_v9 = vmul.f32 %v1968_v44, %v1968_v44  ;;  %v2195_v0 = vpop.f32.mrf.mxu1 }
 0x11f   : > { %v1166_v18 = vsel %vm845_vm3, %v1074_v7, 0.0  ;;  %v1178_v4 = vsel %vm845_vm3, %v1080_v53, 0.0  ;;  %v981_v5 = vsel %vm845_vm3, %v1968_v44, 0.0  ;;  %v1082_v6 = vmul.f32 %v1986_v57, %v1986_v57  ;;  %909 = vst.msk [vmem:[%s1894_s11 + $0x1f8] sm:$0xff] %vm845_vm3, %v2195_v0 }
 0x120   : > { %v970_v19 = vadd.f32 %v969_v14, %v968_v12  ;;  %v1167_v21 = vadd.f32 %v1166_v18, %v1165_v10  ;;  %v2205_v10 = vpop.f32.mrf.mxu1  ;;  %v1083_v12 = vmul.f32 %v1959_v37, %v1959_v37  ;;  %v1180_v14 = vsel %vm845_vm3, %v1081_v9, 0.0 }
 0x121   : > { %v983_v15 = vsel %vm845_vm3, %v1986_v57, 0.0  ;;  %907 = vst.msk [vmem:[%s1894_s11 + $0x1e8] sm:$0xff] %vm845_vm3, %v2205_v10  ;;  %v987_v57 = vsel %vm845_vm3, %v1977_v51, 0.0 }
 0x122   : > { %v972_v30 = vadd.f32 %v971_v26, %v970_v19  ;;  %v1169_v31 = vadd.f32 %v1168_v25, %v1167_v21  ;;  %v985_v19 = vsel %vm845_vm3, %v1959_v37, 0.0  ;;  %v1084_v21 = vmul.f32 %v1977_v51, %v1977_v51 }
 0x123   : > { %v1182_v25 = vsel %vm845_vm3, %v1082_v6, 0.0  ;;  %v989_v37 = vsel %vm845_vm3, %v2004_v8, 0.0  ;;  %v1091_v6 = vmul.f32 %v2031_v33, %v2031_v33 }
 0x124   : > { %v1171_v38 = vadd.f32 %v1170_v34, %v1169_v31  ;;  %v974_v40 = vadd.f32 %v973_v35, %v972_v30  ;;  %v1184_v30 = vsel %vm845_vm3, %v1083_v12, 0.0  ;;  %v1085_v31 = vmul.f32 %v2004_v8, %v2004_v8 }
 0x125   : > { %v1186_v36 = vsel %vm845_vm3, %v1084_v21, 0.0  ;;  %v1088_v8 = vmul.f32 %v2013_v17, %v2013_v17  ;;  %v1003_v21 = vsel %vm845_vm3, %v2049_v49, 0.0 }
 0x126   : > { %v976_v46 = vadd.f32 %v975_v16, %v974_v40  ;;  %v1173_v47 = vadd.f32 %v1172_v45, %v1171_v38  ;;  %v1086_v38 = vmul.f32 %v2022_v24, %v2022_v24  ;;  %v1087_v45 = vmul.f32 %v1995_v1, %v1995_v1 }
 0x127   : > { %v1188_v51 = vsel %vm845_vm3, %v1085_v31, 0.0  ;;  %v991_v16 = vsel %vm845_vm3, %v2022_v24, 0.0  ;;  %v1089_v24 = vmul.f32 %v2040_v41, %v2040_v41 }
 0x128   : > { %v978_v29 = vadd.f32 %v977_v52, %v976_v46  ;;  %v1175_v55 = vadd.f32 %v1174_v54, %v1173_v47  ;;  %v993_v52 = vsel %vm845_vm3, %v1995_v1, 0.0  ;;  %v1190_v53 = vsel %vm845_vm3, %v1086_v38, 0.0 }
 0x129   : > { %v997_v1 = vsel %vm845_vm3, %v2040_v41, 0.0  ;;  %v1092_v41 = vmul.f32 %v2049_v49, %v2049_v49  ;;  %v1009_v38 = vsel %vm845_vm3, %v2067_v2, 0.0 }
 0x12a   : > { %v1177_v62 = vadd.f32 %v1176_v60, %v1175_v55  ;;  %v980_v63 = vadd.f32 %v979_v61, %v978_v29  ;;  %v1192_v55 = vsel %vm845_vm3, %v1087_v45, 0.0  ;;  %v995_v60 = vsel %vm845_vm3, %v2013_v17, 0.0 }
 0x12b   : > { %v1196_v17 = vsel %vm845_vm3, %v1089_v24, 0.0 }
 0x12c   : > { %v982_v23 = vadd.f32 %v981_v5, %v980_v63  ;;  %v1179_v7 = vadd.f32 %v1178_v4, %v1177_v62  ;;  %v1194_v62 = vsel %vm845_vm3, %v1088_v8, 0.0  ;;  %v1090_v63 = vmul.f32 %v2058_v56, %v2058_v56 }
 0x12d   : > { %v1098_v8 = vmul.f32 %v2130_v3, %v2130_v3 }
 0x12e   : > { %v1181_v44 = vadd.f32 %v1180_v14, %v1179_v7  ;;  %v984_v18 = vadd.f32 %v983_v15, %v982_v23  ;;  %v999_v23 = vsel %vm845_vm3, %v2058_v56, 0.0  ;;  %v1001_v14 = vsel %vm845_vm3, %v2031_v33, 0.0 }
 0x12f   : > { %v1198_v15 = vsel %vm845_vm3, %v1090_v63, 0.0  ;;  %v1093_v56 = vmul.f32 %v2076_v11, %v2076_v11  ;;  %v1005_v33 = vsel %vm845_vm3, %v2076_v11, 0.0  ;;  %v1096_v11 = vmul.f32 %v2085_v20, %v2085_v20 }
 0x130   : > { %v986_v26 = vadd.f32 %v985_v19, %v984_v18  ;;  %v1183_v27 = vadd.f32 %v1182_v25, %v1181_v44  ;;  %v1200_v19 = vsel %vm845_vm3, %v1091_v6, 0.0 }
 0x131   : > { %v1204_v49 = vsel %vm845_vm3, %v1093_v56, 0.0 }
 0x132   : > { %v1185_v34 = vadd.f32 %v1184_v30, %v1183_v27  ;;  %v988_v35 = vadd.f32 %v987_v57, %v986_v26  ;;  %v1202_v27 = vsel %vm845_vm3, %v1092_v41, 0.0  ;;  %v1094_v30 = vmul.f32 %v2094_v28, %v2094_v28 }
 0x133   : > { %v1023_v41 = vsel %vm845_vm3, %v2165_v42, 0.0 }
 0x134   : > { %v990_v40 = vadd.f32 %v989_v37, %v988_v35  ;;  %v1187_v43 = vadd.f32 %v1186_v36, %v1185_v34  ;;  %v1095_v34 = vmul.f32 %v2067_v2, %v2067_v2  ;;  %v1007_v35 = vsel %vm845_vm3, %v2094_v28, 0.0 }
 0x135   : > { %v1097_v28 = vmul.f32 %v2112_v48, %v2112_v48  ;;  %v1013_v2 = vsel %vm845_vm3, %v2112_v48, 0.0  ;;  %v1100_v48 = vmul.f32 %v2121_v59, %v2121_v59 }
 0x136   : > { %v1189_v46 = vadd.f32 %v1188_v51, %v1187_v43  ;;  %v992_v47 = vadd.f32 %v991_v16, %v990_v40  ;;  %v1206_v40 = vsel %vm845_vm3, %v1094_v30, 0.0  ;;  %v1208_v51 = vsel %vm845_vm3, %v1095_v34, 0.0 }
 0x137   : > { %v1011_v16 = vsel %vm845_vm3, %v2085_v20, 0.0  ;;  %v1212_v20 = vsel %vm845_vm3, %v1097_v28, 0.0 }
 0x138   : > { %v994_v54 = vadd.f32 %v993_v52, %v992_v47  ;;  %v1191_v29 = vadd.f32 %v1190_v53, %v1189_v46  ;;  %v1210_v52 = vsel %vm845_vm3, %v1096_v11, 0.0 }
 0x13a   : > { %v1193_v61 = vadd.f32 %v1192_v55, %v1191_v29  ;;  %v996_v9 = vadd.f32 %v995_v60, %v994_v54  ;;  %v1099_v29 = vmul.f32 %v2103_v39, %v2103_v39  ;;  %v1015_v55 = vsel %vm845_vm3, %v2130_v3, 0.0 }
 0x13b   : > { %v1101_v3 = vmul.f32 %v2146_v22, %v2146_v22 }
 0x13c   : > { %v998_v4 = vadd.f32 %v997_v1, %v996_v9  ;;  %v1195_v5 = vadd.f32 %v1194_v62, %v1193_v61  ;;  %v1017_v61 = vsel %vm845_vm3, %v2103_v39, 0.0  ;;  %v1214_v9 = vsel %vm845_vm3, %v1098_v8, 0.0 }
 0x13d   : > { %v1216_v63 = vsel %vm845_vm3, %v1099_v29, 0.0  ;;  %v1021_v39 = vsel %vm845_vm3, %v2146_v22, 0.0  ;;  %v1104_v22 = vmul.f32 %v2155_v32, %v2155_v32 }
 0x13e   : > { %v1197_v7 = vadd.f32 %v1196_v17, %v1195_v5  ;;  %v1000_v12 = vadd.f32 %v999_v23, %v998_v4  ;;  %v1019_v4 = vsel %vm845_vm3, %v2121_v59, 0.0  ;;  %v1218_v17 = vsel %vm845_vm3, %v1100_v48, 0.0 }
 0x13f   : > { %v1102_v23 = vmul.f32 %v2165_v42, %v2165_v42  ;;  %v1220_v59 = vsel %vm845_vm3, %v1101_v3, 0.0  ;;  %v1105_v42 = vmul.f32 %v2185_v58, %v2185_v58  ;;  %v1226_v30 = vsel %vm845_vm3, %v1104_v22, 0.0 }
 0x140   : > { %v1002_v44 = vadd.f32 %v1001_v14, %v1000_v12  ;;  %v1199_v18 = vadd.f32 %v1198_v15, %v1197_v7  ;;  %v1103_v14 = vmul.f32 %v2139_v13, %v2139_v13 }
 0x142   : > { %v1201_v25 = vadd.f32 %v1200_v19, %v1199_v18  ;;  %v1004_v26 = vadd.f32 %v1003_v21, %v1002_v44  ;;  %v1025_v18 = vsel %vm845_vm3, %v2139_v13, 0.0  ;;  %v1222_v19 = vsel %vm845_vm3, %v1102_v23, 0.0 }
 0x143   : > { %v1029_v13 = vsel %vm845_vm3, %v2185_v58, 0.0  ;;  %v1108_v58 = vmul.f32 %v2195_v0, %v2195_v0 }
 0x144   : > { %v1006_v57 = vadd.f32 %v1005_v33, %v1004_v26  ;;  %v1203_v31 = vadd.f32 %v1202_v27, %v1201_v25  ;;  %v1224_v25 = vsel %vm845_vm3, %v1103_v14, 0.0  ;;  %v1027_v26 = vsel %vm845_vm3, %v2155_v32, 0.0 }
 0x145   : > { %v1228_v32 = vsel %vm845_vm3, %v1105_v42, 0.0  ;;  %v1234_v28 = vsel %vm845_vm3, %v1108_v58, 0.0 }
 0x146   : > { %v1205_v36 = vadd.f32 %v1204_v49, %v1203_v31  ;;  %v1008_v37 = vadd.f32 %v1007_v35, %v1006_v57  ;;  %v1106_v57 = vmul.f32 %v2205_v10, %v2205_v10  ;;  %v1107_v49 = vmul.f32 %v2175_v50, %v2175_v50 }
 0x147   : > { %v1031_v35 = vsel %vm845_vm3, %v2205_v10, 0.0 }
 0x148   : > { %v1010_v43 = vadd.f32 %v1009_v38, %v1008_v37  ;;  %v1207_v45 = vadd.f32 %v1206_v40, %v1205_v36  ;;  %v1033_v38 = vsel %vm845_vm3, %v2175_v50, 0.0  ;;  %v1230_v11 = vsel %vm845_vm3, %v1106_v57, 0.0 }
 0x14a   : > { %v1209_v46 = vadd.f32 %v1208_v51, %v1207_v45  ;;  %v1012_v47 = vadd.f32 %v1011_v16, %v1010_v43  ;;  %v1232_v45 = vsel %vm845_vm3, %v1107_v49, 0.0  ;;  %v1035_v51 = vsel %vm845_vm3, %v2195_v0, 0.0 }
 0x14c   : > { %v1014_v53 = vadd.f32 %v1013_v2, %v1012_v47  ;;  %v1211_v54 = vadd.f32 %v1210_v52, %v1209_v46 }
 0x14e   : > { %v1213_v60 = vadd.f32 %v1212_v20, %v1211_v54  ;;  %v1016_v24 = vadd.f32 %v1015_v55, %v1014_v53 }
 0x150   : > { %v1018_v62 = vadd.f32 %v1017_v61, %v1016_v24  ;;  %v1215_v1 = vadd.f32 %v1214_v9, %v1213_v60 }
 0x152   : > { %v1217_v5 = vadd.f32 %v1216_v63, %v1215_v1  ;;  %v1020_v6 = vadd.f32 %v1019_v4, %v1018_v62 }
 0x154   : > { %v1022_v7 = vadd.f32 %v1021_v39, %v1020_v6  ;;  %v1219_v12 = vadd.f32 %v1218_v17, %v1217_v5 }
 0x156   : > { %v1221_v15 = vadd.f32 %v1220_v59, %v1219_v12  ;;  %v1024_v44 = vadd.f32 %v1023_v41, %v1022_v7 }
 0x158   : > { %v1026_v21 = vadd.f32 %v1025_v18, %v1024_v44  ;;  %v1223_v56 = vadd.f32 %v1222_v19, %v1221_v15 }
 0x15a   : > { %v1225_v27 = vadd.f32 %v1224_v25, %v1223_v56  ;;  %v1028_v33 = vadd.f32 %v1027_v26, %v1026_v21 }
 0x15c   : > { %v1030_v31 = vadd.f32 %v1029_v13, %v1028_v33  ;;  %v1227_v34 = vadd.f32 %v1226_v30, %v1225_v27 }
 0x15e   : > { %v1229_v36 = vadd.f32 %v1228_v32, %v1227_v34  ;;  %v1032_v37 = vadd.f32 %v1031_v35, %v1030_v31 }
 0x160   : > { %v1034_v40 = vadd.f32 %v1033_v38, %v1032_v37  ;;  %v1231_v43 = vadd.f32 %v1230_v11, %v1229_v36 }
 0x162   : > { %v1036_v16 = vadd.f32 %v1035_v51, %v1034_v40  ;;  %v1233_v10 = vadd.f32 %v1232_v45, %v1231_v43 }
 0x164   : > { %v1037_v46 = vrot.slane %v1036_v16, 4  ;;  %v1235_v47 = vadd.f32 %v1234_v28, %v1233_v10 }
 0x166   : > { %v1038_v50 = vadd.f32 %v1037_v46, %v1036_v16  ;;  %v1236_v52 = vrot.slane %v1235_v47, 4 }
 0x168   : > { %v1039_v2 = vrot.slane %v1038_v50, 2  ;;  %v1237_v8 = vadd.f32 %v1236_v52, %v1235_v47 }
 0x16a   : > { %v1040_v53 = vadd.f32 %v1039_v2, %v1038_v50  ;;  %v1238_v54 = vrot.slane %v1237_v8, 2 }
 0x16c   : > { %v1041_v0 = vrot.slane %v1040_v53, 1  ;;  %v1239_v29 = vadd.f32 %v1238_v54, %v1237_v8 }
 0x16e   : > { %v1042_v20 = vadd.f32 %v1041_v0, %v1040_v53  ;;  %v1240_v55 = vrot.slane %v1239_v29, 1 }
 0x170   : > { %1044 = vst.msk [vmem:[%s201_s14] sm:$0x1] %vm1043_vm4, %v1042_v20  ;;  %v1241_v60 = vadd.f32 %v1240_v55, %v1239_v29 }
 0x171   : > { %1659 = shalt.err (!%p1656_p3)
}
 0x172   : > { %s1660_s11 = scalar_lea.hbm %s2355_s29, 16  ;;  %s1664_s27 = scalar_lea.hbm %s2432_s3, 32 }
 0x173   : > { %p1661_p4 = scmp.ne.s32.totalorder %s2355_s29, %s1660_s11  ;;  %p1665_p9 = scmp.lt.s32.totalorder %s2355_s29, %s2432_s3 }
 0x174   : > { %p1666_p10 = scmp.lt.s32.totalorder %s1664_s27, %s1660_s11 }
 0x175   : > { %p1662_p7 = pnand %p1661_p4, %p1804_p5 }
 0x176   : > { %p1667_p11 = por %p1666_p10, %p1665_p9 }
 0x177   : > { %p1663_p8 = pneg %p1662_p7 }
 0x179   : > { %p1668_p12 = pnand %p1667_p11, %p1663_p8 }
 0x17b   : > { %1671 = shalt.err (!%p1668_p12)
}
 0x17c   : > { %1568 = dma.vmem_to_hbm [thread:$0]  (%p1804_p5), %s2357_s20, 16, %s2355_s29, %s1249_s6   ;;  %1242 = vst.msk [vmem:[%s207_s22] sm:$0x1] %vm1043_vm4, %v1241_v60 }
 0x17d   : > { %s1253_s30 = scalar_lea.sflag [#allocation5], %s2345_s12  ;;  %s1672_s7 = scalar_lea.vmem %s2365_s23, 16 }
 0x17e   : > { %p1673_p13 = scmp.ne.s32.totalorder %s2365_s23, %s1672_s7  ;;  %s1740_s8 = smov [#allocation4]  }
 0x17f   : > { %s1676_s9 = sshll.u32 %s1740_s8, 4  ;;  %s1677_s9 = int_to_ptr.vmem [resolvable:$false] %s1676_s9 }
 0x180   : > { %p1674_p0 = pnand %p1673_p13, %p1804_p5  ;;  %s1678_s10 = scalar_lea.vmem %s1677_s9, 32 }
 0x181   : > { %p1679_p2 = scmp.lt.s32.totalorder %s2365_s23, %s1677_s9  ;;  %p1680_p3 = scmp.lt.s32.totalorder %s1678_s10, %s1672_s7 }
 0x182   : > { %p1675_p1 = pneg %p1674_p0 }
 0x183   : > { %p1681_p4 = por %p1680_p3, %p1679_p2 }
 0x185   : > { %p1682_p7 = pnand %p1681_p4, %p1675_p1 }
 0x187   : > { %1685 = shalt.err (!%p1682_p7)
}
 0x188   : > { %s1686_s20 = scalar_lea.hbm %s2363_s5, 16  ;;  %s1690_s29 = scalar_lea.hbm %s2433_s4, 32 }
 0x189   : > { %p1687_p8 = scmp.ne.s32.totalorder %s2363_s5, %s1686_s20  ;;  %p1691_p11 = scmp.lt.s32.totalorder %s2363_s5, %s2433_s4 }
 0x18a   : > { %p1692_p12 = scmp.lt.s32.totalorder %s1690_s29, %s1686_s20 }
 0x18b   : > { %p1688_p9 = pnand %p1687_p8, %p1804_p5 }
 0x18c   : > { %p1693_p13 = por %p1692_p12, %p1691_p11 }
 0x18d   : > { %p1689_p10 = pneg %p1688_p9 }
 0x18f   : > { %p1694_p0 = pnand %p1693_p13, %p1689_p10 }
 0x191   : > { %1697 = shalt.err (!%p1694_p0)
}
 0x192   : > { %1569 = dma.vmem_to_hbm [thread:$0]  (%p1804_p5), %s2365_s23, 16, %s2363_s5, %s1253_s30  }
 0x193 PF: > { %p1579_p1 = scmp.ge.s32.totalorder %s1736_s18, 2  ;;  %s1302_s13 = sand.u32 1, %s1724_s15  }
 0x194   : > { %s1303_s14 = scalar_lea.sflag [#allocation3], %s1302_s13 }
 0x195   : > { %p1573_p2 = pnand %p1579_p1, %p1808_p6 }
 0x197   : > { %p1574_p3 = pneg %p1573_p2 }
 0x199   : > { %1715 = dma.done.wait (%p1574_p3), %s1303_s14, 16  }
 0x19a   : > { %1717 = vsyncadd (%p1574_p3), %s1303_s14, 4294967280  ;;  %s1311_s27 = scalar_lea.sflag [#allocation5], %s1302_s13 }
 0x19b   : > { %1719 = dma.done.wait (%p1574_p3), %s1311_s27, 16  }
 0x19c   : > { %1721 = vsyncadd (%p1574_p3), %s1311_s27, 4294967280  ;;  %p18_p5 = scmp.ge.s32.totalorder %s1791_s21, 4   ;;  %s2436_s15 = smov %s1728_s16 }
 0x19d   : > { %s2437_s16 = smov %s1732_s17  ;;  %s2438_s17 = smov %s1802_s24 }
 0x19e   : > { %s2439_s18 = smov %s1791_s21  ;;  %20 = sbr.rel (!%p18_p5) target bundleno = 5 (0x5), region = 92 }
 0x1a3   :  { %1315 = vsyncpa [#allocation3], 1 }
 0x1a4   :  { %1317 = vsyncpa [#allocation3 + $0x1], 1 }
 0x1a5   :  { %1318 = vsyncpa [#allocation5], 1 }
 0x1a6   :  { %1320 = vsyncpa [#allocation5 + $0x1], 1 }

</bundles_post_ra>
